<compile_context>
chip_gen: v6e
topology: v6e:2x2x1
jax: 0.10.0
libtpu: 0.0.40
codegen_flags: <defaults>
</compile_context>

<pallas_src>
import functools
import math

import jax
import jax.numpy as jnp
import numpy as np
from jax.experimental import pallas as pl
from jax.experimental.pallas import tpu as pltpu


_LANE = 128
_SUBLANE = 8
_TILE_VMEM_BUDGET = 24 * 1024 * 1024   # double-buffered tile footprint budget
_VMEM_LIMIT_BYTES = 48 * 1024 * 1024   # scoped VMEM limit (safe on v5e/v6e/v7x)
_MAX_TM = 1024


# ----------------------------- Pallas kernels ------------------------------

def _scale(x_f32, w_f32, eps, valid_h):
    """out = w * x * rsqrt(mean(x[:, :valid_h]^2) + eps) on one (tm, W) tile."""
    W = x_f32.shape[-1]
    if valid_h == W:
        var = jnp.mean(x_f32 * x_f32, axis=-1, keepdims=True)
    else:
        lane = jax.lax.broadcasted_iota(jnp.int32, x_f32.shape, x_f32.ndim - 1)
        xsq = jnp.where(lane < valid_h, x_f32 * x_f32, 0.0)
        var = jnp.sum(xsq, axis=-1, keepdims=True) * (1.0 / float(valid_h))
    inv = jax.lax.rsqrt(var + eps)
    return w_f32 * (x_f32 * inv)


def _rmsnorm_kernel(x_ref, w_ref, o_ref, *, eps, valid_h):
    x = x_ref[...].astype(jnp.float32)
    o_ref[...] = _scale(x, w_ref[...], eps, valid_h).astype(o_ref.dtype)


def _rmsnorm_gated_kernel(x_ref, g_ref, w_ref, o_ref, *, eps, valid_h):
    x = x_ref[...].astype(jnp.float32)
    g = g_ref[...].astype(jnp.float32)
    x = x * (g * jax.nn.sigmoid(g))                      # x * silu(gate)
    o_ref[...] = _scale(x, w_ref[...], eps, valid_h).astype(o_ref.dtype)


def _scale_seg(x_f32, w_f32, seg_f32, eps, inv_n):
    """Folded variant: k logical rows share the 128 lanes.

    seg_f32[j, i] == 1 iff input column j belongs to the same segment as
    output column i AND j's within-segment position is < valid_h.  The matmul
    therefore broadcasts each segment's sum-of-squares to every lane of that
    segment, keeping all intermediates lane-dense (no in-kernel reshapes).
    """
    segsum = jnp.dot(x_f32 * x_f32, seg_f32, preferred_element_type=jnp.float32)
    inv = jax.lax.rsqrt(segsum * inv_n + eps)
    return w_f32 * (x_f32 * inv)


def _rmsnorm_seg_kernel(x_ref, w_ref, seg_ref, o_ref, *, eps, inv_n):
    x = x_ref[...].astype(jnp.float32)
    o_ref[...] = _scale_seg(x, w_ref[...], seg_ref[...], eps, inv_n).astype(o_ref.dtype)


def _rmsnorm_gated_seg_kernel(x_ref, g_ref, w_ref, seg_ref, o_ref, *, eps, inv_n):
    x = x_ref[...].astype(jnp.float32)
    g = g_ref[...].astype(jnp.float32)
    x = x * (g * jax.nn.sigmoid(g))
    o_ref[...] = _scale_seg(x, w_ref[...], seg_ref[...], eps, inv_n).astype(o_ref.dtype)


# ------------------------------ Tiling helper -------------------------------

def _choose_tm(R, W, n_inputs, in_itemsize, out_itemsize):
    """Largest row tile whose double-buffered footprint fits the VMEM budget."""
    per_row = 2 * W * (n_inputs * in_itemsize + out_itemsize)   # 2x: double buffer
    tm = _TILE_VMEM_BUDGET // max(per_row, 1)
    tm = int(min(tm, _MAX_TM))
    tm = max(_SUBLANE, (tm // _SUBLANE) * _SUBLANE)
    # Keep several grid steps when R is large so the "parallel" axis can be
    # sharded across both TensorCores on v7x.
    if R > 4 * _SUBLANE:
        tm = min(tm, max(_SUBLANE, (R // 4) // _SUBLANE * _SUBLANE))
    if tm >= R:
        tm = R   # a block equal to the full row extent is always a legal block
    return tm


# ------------------------------ pallas_call wrapper --------------------------

def _call_rmsnorm(x2d, weight_vec, gate2d, eps, *, width=None, valid_h=None,
                  out_dtype=jnp.float32):
    """x2d: (R, H); weight_vec: (W,) f32; gate2d: (R, H) or None.

    Only the first `width` (default H) columns are DMA'd via the BlockSpec;
    the variance is computed over the first `valid_h` (default width) columns.
    `width` must be the full hidden dim or a multiple of 128.  Returns (R, W).
    """
    R, H = x2d.shape
    W = H if width is None else int(width)
    assert W == H or W % _LANE == 0, (
        "column window must be the full hidden dim or a multiple of 128")
    vh = W if valid_h is None else int(valid_h)
    assert 0 < vh <= W

    # --- lane-dense fold for small hidden sizes -----------------------------
    k = 1
    if W == H and W < _LANE:
        k = _LANE // math.gcd(_LANE, W)      # lcm(W, 128) / W
        if k <= 1 or (R % k) != 0:
            k = 1                            # fall back to masked stores

    if k > 1:
        Wf = k * W
        xw = x2d.reshape(R // k, Wf)                       # free contiguous reshape
        gw = None if gate2d is None else gate2d.reshape(R // k, Wf)
        w_row = jnp.tile(weight_vec.astype(jnp.float32), k).reshape(1, Wf)
        j = np.arange(Wf)
        seg_np = ((j[:, None] // W) == (j[None, :] // W)) & ((j[:, None] % W) < vh)
        seg = jnp.asarray(seg_np, jnp.float32)             # (Wf, Wf) constant
        Rr, Wr = R // k, Wf
    else:
        xw, gw = x2d, gate2d
        w_row = weight_vec.astype(jnp.float32).reshape(1, W)
        seg = None
        Rr, Wr = R, W

    n_in = 1 if gw is None else 2
    tm = _choose_tm(Rr, Wr, n_in, x2d.dtype.itemsize, np.dtype(out_dtype).itemsize)
    grid = (pl.cdiv(Rr, tm),)   # ragged last tile: OOB writes are masked by Pallas

    row_spec = pl.BlockSpec((tm, Wr), lambda i: (i, 0))
    w_spec = pl.BlockSpec((1, Wr), lambda i: (0, 0))
    out_shape = jax.ShapeDtypeStruct((Rr, Wr), out_dtype)
    cparams = pltpu.CompilerParams(
        dimension_semantics=("parallel",),
        vmem_limit_bytes=_VMEM_LIMIT_BYTES,
    )

    if seg is not None:
        seg_spec = pl.BlockSpec((Wr, Wr), lambda i: (0, 0))   # resident: index never changes
        inv_n = 1.0 / float(vh)
        if gw is not None:
            kern = functools.partial(_rmsnorm_gated_seg_kernel, eps=eps, inv_n=inv_n)
            in_specs = [row_spec, row_spec, w_spec, seg_spec]
            args = (xw, gw, w_row, seg)
        else:
            kern = functools.partial(_rmsnorm_seg_kernel, eps=eps, inv_n=inv_n)
            in_specs = [row_spec, w_spec, seg_spec]
            args = (xw, w_row, seg)
    else:
        if gw is not None:
            kern = functools.partial(_rmsnorm_gated_kernel, eps=eps, valid_h=vh)
            in_specs = [row_spec, row_spec, w_spec]
            args = (xw, gw, w_row)
        else:
            kern = functools.partial(_rmsnorm_kernel, eps=eps, valid_h=vh)
            in_specs = [row_spec, w_spec]
            args = (xw, w_row)

    out = pl.pallas_call(
        kern,
        out_shape=out_shape,
        grid=grid,
        in_specs=in_specs,
        out_specs=row_spec,
        compiler_params=cparams,
    )(*args)

    if k > 1:
        out = out.reshape(R, W)   # free contiguous reshape back
    return out


# --------------------------- Module-level wrapper ---------------------------

class MixedRMSNormGatedV2Pallas:
    """JAX/Pallas port of MixedRMSNormGatedV2."""

    def __init__(self, hidden_size_list, max_hidden_size, rms_weight, eps=1e-6):
        self.hidden_size_list = list(hidden_size_list)
        self.max_hidden_size = int(max_hidden_size)
        self.rms_weight = jnp.asarray(rms_weight, jnp.float32)  # (max_hidden_size,)
        self.eps = float(eps)

    def _mixed_weight(self, weights):
        """weights: length-len(hidden_size_list) mixing coefficients (tiny glue)."""
        w_mix = jnp.zeros((self.max_hidden_size,), jnp.float32)
        for i, emb in enumerate(self.hidden_size_list):
            padded = jnp.pad(self.rms_weight[:emb], (0, self.max_hidden_size - emb))
            w_mix = w_mix + jnp.asarray(weights[i], jnp.float32) * padded
        return w_mix

    def __call__(self, x, weights, use_argmax=False, gate=None,
                 out_dtype=jnp.float32):
        # x: (B, S, H_max); gate: same shape or None; weights: small 1-D mix coeffs.
        B, S, H = x.shape
        assert H == self.max_hidden_size
        x2d = x.reshape(B * S, H)
        g2d = None if gate is None else gate.reshape(B * S, H)

        if use_argmax:
            # TODO(synk): the argmax branch's output *shape* depends on the
            # mixing weights, so they must be concrete at trace time (same
            # data-dependent-shape behaviour as the PyTorch module).
            w_np = np.asarray(weights)
            idx = int(np.argmax(w_np))
            h = self.hidden_size_list[idx]
            scale = jnp.asarray(w_np[idx], jnp.float32)

            if h == H:
                out = _call_rmsnorm(x2d, scale * self.rms_weight, g2d, self.eps,
                                    out_dtype=out_dtype)
                return out.reshape(B, S, H)

            # Column window expressed in the BlockSpec (no wrapper-side slice
            # of the inputs -> no extra HBM round trip). Non-aligned h: round
            # the window up and mask the variance in-kernel.
            h_blk = min(((h + _LANE - 1) // _LANE) * _LANE, H)
            weight = scale * self.rms_weight[:h]
            if h_blk != h:
                weight = jnp.pad(weight, (0, h_blk - h))
            out = _call_rmsnorm(x2d, weight, g2d, self.eps,
                                width=h_blk, valid_h=h, out_dtype=out_dtype)
            if h_blk != h:
                out = out[:, :h]   # small output-side trim only
            return out.reshape(B, S, h)
        else:
            w_mix = self._mixed_weight(weights)
            out = _call_rmsnorm(x2d, w_mix, g2d, self.eps, out_dtype=out_dtype)
            return out.reshape(B, S, H)


# --------------------------------- Reference ---------------------------------

def _ref_forward(x, gate, weight_vec, eps):
    x = x.astype(jnp.float32)
    if gate is not None:
        g = gate.astype(jnp.float32)
        x = x * (g * jax.nn.sigmoid(g))
    var = jnp.mean(x * x, axis=-1, keepdims=True)
    return weight_vec * (x * jax.lax.rsqrt(var + eps))


# ----------------------------------- Main ------------------------------------

if __name__ == "__main__":
    B, S = 2, 8
    hidden_size_list = [16, 24, 32]
    max_hidden_size = 32
    eps = 1e-6

    key = jax.random.PRNGKey(0)
    kx, kg = jax.random.split(key, 2)
    x = jax.random.normal(kx, (B, S, max_hidden_size), jnp.bfloat16)
    gate = jax.random.normal(kg, (B, S, max_hidden_size), jnp.bfloat16)
    # Deterministic "parameter" init for rms_norm.weight (shape (max_hidden_size,)).
    rms_weight = 1.0 + 0.01 * jnp.arange(max_hidden_size, dtype=jnp.float32)
    mix_weights = jnp.array([0.2, 0.3, 0.5], jnp.float32)

    mod = MixedRMSNormGatedV2Pallas(hidden_size_list, max_hidden_size, rms_weight, eps)

    # 1) Mixed branch (with gate) -- exercises the lane-dense fold path (H=32<128).
    out_mixed = mod(x, mix_weights, use_argmax=False, gate=gate)
    jax.block_until_ready(out_mixed)
    ref_mixed = _ref_forward(x, gate, mod._mixed_weight(mix_weights), eps)
    np.testing.assert_allclose(np.asarray(out_mixed), np.asarray(ref_mixed),
                               rtol=2e-2, atol=2e-2)

    # 2) Argmax branch, h == H (no gate).
    out_argmax = mod(x, mix_weights, use_argmax=True, gate=None)
    jax.block_until_ready(out_argmax)
    idx = int(np.argmax(np.asarray(mix_weights)))
    h = hidden_size_list[idx]
    ref_argmax = _ref_forward(x[..., :h], None,
                              mix_weights[idx] * rms_weight[:h], eps)
    np.testing.assert_allclose(np.asarray(out_argmax), np.asarray(ref_argmax),
                               rtol=2e-2, atol=2e-2)

    # 3) Argmax branch, h < H (exercises per-segment variance masking), with gate.
    mix_weights2 = jnp.array([0.6, 0.3, 0.1], jnp.float32)   # argmax -> h = 16
    out_argmax2 = mod(x, mix_weights2, use_argmax=True, gate=gate)
    jax.block_until_ready(out_argmax2)
    h2 = hidden_size_list[0]
    ref_argmax2 = _ref_forward(x[..., :h2], gate[..., :h2],
                               mix_weights2[0] * rms_weight[:h2], eps)
    np.testing.assert_allclose(np.asarray(out_argmax2), np.asarray(ref_argmax2),
                               rtol=2e-2, atol=2e-2)

    print("KERNEL_OK")
</pallas_src>

<mosaic_0001>
module attributes {stable_mosaic.version = 11 : i64} {
  func.func @_rmsnorm_gated_seg_kernel(%arg0: i32, %arg1: memref<4x128xbf16, #tpu.memory_space<vmem>>, %arg2: memref<4x128xbf16, #tpu.memory_space<vmem>>, %arg3: memref<1x128xf32, #tpu.memory_space<vmem>>, %arg4: memref<128x128xf32, #tpu.memory_space<vmem>>, %arg5: memref<4x128xf32, #tpu.memory_space<vmem>>) attributes {dimension_semantics = [#tpu.dimension_semantics<parallel>], iteration_bounds = array<i64: 1>, scalar_prefetch = 0 : i64, scratch_operands = 0 : i64, tpu.core_type = #tpu.core_type<tc>, window_params = [{transform_indices = @transform_0, window_bounds = array<i64: 4, 128>}, {transform_indices = @transform_1, window_bounds = array<i64: 4, 128>}, {pipeline_mode = #tpu.pipeline_mode<synchronous>, transform_indices = @transform_2, window_bounds = array<i64: 1, 128>}, {pipeline_mode = #tpu.pipeline_mode<synchronous>, transform_indices = @transform_3, window_bounds = array<i64: 128, 128>}, {transform_indices = @transform_4, window_bounds = array<i64: 4, 128>}]} {
    %c0 = arith.constant 0 : index
    %c0_0 = arith.constant 0 : index
    %0 = vector.load %arg1[%c0, %c0_0] : memref<4x128xbf16, #tpu.memory_space<vmem>>, vector<4x128xbf16>
    %1 = arith.extf %0 : vector<4x128xbf16> to vector<4x128xf32>
    %c0_1 = arith.constant 0 : index
    %c0_2 = arith.constant 0 : index
    %2 = vector.load %arg2[%c0_1, %c0_2] : memref<4x128xbf16, #tpu.memory_space<vmem>>, vector<4x128xbf16>
    %3 = arith.extf %2 : vector<4x128xbf16> to vector<4x128xf32>
    %4 = arith.negf %3 : vector<4x128xf32>
    %5 = math.exp %4 : vector<4x128xf32>
    %cst = arith.constant 1.000000e+00 : f32
    %6 = vector.broadcast %cst : f32 to vector<4x128xf32>
    %7 = arith.addf %6, %5 : vector<4x128xf32>
    %8 = arith.divf %6, %7 : vector<4x128xf32>
    %9 = arith.mulf %3, %8 : vector<4x128xf32>
    %10 = arith.mulf %1, %9 : vector<4x128xf32>
    %c0_3 = arith.constant 0 : index
    %c0_4 = arith.constant 0 : index
    %11 = vector.load %arg3[%c0_3, %c0_4] : memref<1x128xf32, #tpu.memory_space<vmem>>, vector<1x128xf32>
    %c0_5 = arith.constant 0 : index
    %c0_6 = arith.constant 0 : index
    %12 = vector.load %arg4[%c0_5, %c0_6] : memref<128x128xf32, #tpu.memory_space<vmem>>, vector<128x128xf32>
    %13 = arith.mulf %10, %10 : vector<4x128xf32>
    %cst_7 = arith.constant dense<0.000000e+00> : vector<4x128xf32>
    %14 = tpu.matmul %13, %12, %cst_7 {dimension_numbers = #tpu.dot_dimension_numbers<[1], [0], [0], [1], [0, 0, 1, 1], [], []>} : vector<4x128xf32>, vector<128x128xf32>, vector<4x128xf32> -> vector<4x128xf32>
    %cst_8 = arith.constant 3.125000e-02 : f32
    %15 = vector.broadcast %cst_8 : f32 to vector<4x128xf32>
    %16 = arith.mulf %14, %15 : vector<4x128xf32>
    %cst_9 = arith.constant 9.99999997E-7 : f32
    %17 = vector.broadcast %cst_9 : f32 to vector<4x128xf32>
    %18 = arith.addf %16, %17 : vector<4x128xf32>
    %19 = math.rsqrt %18 : vector<4x128xf32>
    %20 = arith.mulf %10, %19 : vector<4x128xf32>
    %21 = vector.broadcast %11 : vector<1x128xf32> to vector<4x128xf32>
    %22 = arith.mulf %21, %20 : vector<4x128xf32>
    %c0_10 = arith.constant 0 : index
    %c0_11 = arith.constant 0 : index
    %23 = vector.load %arg5[%c0_10, %c0_11] : memref<4x128xf32, #tpu.memory_space<vmem>>, vector<4x128xf32>
    tpu.vector_store %arg5[%c0_10, %c0_11], %22 {strides = array<i32>} : memref<4x128xf32, #tpu.memory_space<vmem>>, vector<4x128xf32>,
    return
  }
  func.func @transform_0(%arg0: i32) -> (i32, i32) {
    %c0_i32 = arith.constant 0 : i32
    %c0_i32_0 = arith.constant 0 : i32
    return %arg0, %c0_i32 : i32, i32
  }
  func.func @transform_1(%arg0: i32) -> (i32, i32) {
    %c0_i32 = arith.constant 0 : i32
    %c0_i32_0 = arith.constant 0 : i32
    return %arg0, %c0_i32 : i32, i32
  }
  func.func @transform_2(%arg0: i32) -> (i32, i32) {
    %c0_i32 = arith.constant 0 : i32
    %c0_i32_0 = arith.constant 0 : i32
    %c0_i32_1 = arith.constant 0 : i32
    return %c0_i32, %c0_i32_0 : i32, i32
  }
  func.func @transform_3(%arg0: i32) -> (i32, i32) {
    %c0_i32 = arith.constant 0 : i32
    %c0_i32_0 = arith.constant 0 : i32
    %c0_i32_1 = arith.constant 0 : i32
    return %c0_i32, %c0_i32_0 : i32, i32
  }
  func.func @transform_4(%arg0: i32) -> (i32, i32) {
    %c0_i32 = arith.constant 0 : i32
    %c0_i32_0 = arith.constant 0 : i32
    return %arg0, %c0_i32 : i32, i32
  }
}

</mosaic_0001>

<bundles_post_ra>
// kernel: tpu_custom_call.1
= control target key start
LH: loop header
LB: loop body
LE: loop exit
PB: predicated region body
PF: predicated region fallthrough
CT: control target
= control target key end

     0   :  { %9 = vsyncpa [#allocation3], 0  ;;  %s385_s0 = inlined_call_operand.hbm [shape: bf16[4,128], index: 0, kind: input, shape index: {}]   ;;  %s386_s1 = inlined_call_operand.hbm [shape: bf16[4,128], index: 1, kind: input, shape index: {}]   ;;  %s387_s2 = inlined_call_operand.vmem [shape: f32[1,128], index: 2, kind: input, shape index: {}]   ;;  %s388_s3 = inlined_call_operand.hbm [shape: f32[128,128], index: 3, kind: input, shape index: {}]   ;;  %s389_s4 = inlined_call_operand.hbm [shape: f32[4,128], index: 4, kind: output, shape index: {}]  }
   0x1   :  { %10 = vsyncpa [#allocation6], 0 }
   0x2   :  { %11 = vsyncpa [#allocation4], 0  ;;  %s337_s15 = smov [#allocation5]   ;;  %s338_s17 = smov [#allocation2]  }
   0x3   :  { %s28_s16 = sshll.u32 %s337_s15, 4  ;;  %s18_s18 = sshll.u32 %s338_s17, 4  ;;  %s29_s16 = int_to_ptr.vmem [resolvable:$true] %s28_s16  ;;  %s19_s18 = int_to_ptr.vmem [resolvable:$true] %s18_s18 }
   0x4   :  { %s259_s19 = scalar_lea.vmem %s29_s16, 32  ;;  %p264_p1 = scmp.lt.s32.totalorder %s29_s16, %s29_s16 }
   0x5   :  { %p260_p0 = scmp.ne.s32.totalorder %s29_s16, %s259_s19  ;;  %p265_p2 = scmp.lt.s32.totalorder %s259_s19, %s259_s19 }
   0x7   :  { %p266_p3 = por %p265_p2, %p264_p1 }
   0x9   :  { %p267_p4 = pnand %p266_p3, %p260_p0 }
   0xb   :  { %270 = shalt.err (!%p267_p4)
}
   0xc   :  { %31 = dma.hbm_to_vmem [thread:$0]  %s386_s1, 32, %s29_s16, [#allocation6]  }
   0xd   :  { %s279_s22 = scalar_lea.vmem %s19_s18, 32  ;;  %p284_p6 = scmp.lt.s32.totalorder %s19_s18, %s19_s18 }
   0xe   :  { %p280_p5 = scmp.ne.s32.totalorder %s19_s18, %s279_s22  ;;  %p285_p7 = scmp.lt.s32.totalorder %s279_s22, %s279_s22 }
  0x10   :  { %p286_p8 = por %p285_p7, %p284_p6 }
  0x12   :  { %p287_p9 = pnand %p286_p8, %p280_p5 }
  0x14   :  { %290 = shalt.err (!%p287_p9)
}
  0x15   :  { %21 = dma.hbm_to_vmem [thread:$0]  %s385_s0, 32, %s19_s18, [#allocation3]  }
  0x16   :  { %s339_s25 = smov [#allocation7]  }
  0x17   :  { %s39_s26 = sshll.u32 %s339_s25, 4  ;;  %s40_s26 = int_to_ptr.vmem [resolvable:$true] %s39_s26 }
  0x18   :  { %s299_s27 = scalar_lea.vmem %s40_s26, 2048  ;;  %p304_p11 = scmp.lt.s32.totalorder %s40_s26, %s40_s26 }
  0x19   :  { %p300_p10 = scmp.ne.s32.totalorder %s40_s26, %s299_s27  ;;  %p305_p12 = scmp.lt.s32.totalorder %s299_s27, %s299_s27 }
  0x1b   :  { %p306_p13 = por %p305_p12, %p304_p11 }
  0x1d   :  { %p307_p0 = pnand %p306_p13, %p300_p10 }
  0x1f   :  { %310 = shalt.err (!%p307_p0)
}
  0x20   :  { %s340_s1 = smov 128   ;;  %s341_s28 = smov 8  }
  0x21   :  { %45 = dma.hbm_to_vmem [thread:$0]  %s388_s3, 2048, %s40_s26, [#allocation6], %s340_s1, %s340_s1, %s341_s28  }
  0x22   :  { %331 = dma.done.wait [#allocation3], 32  }
  0x23   :  { %332 = vsyncadd [#allocation3], 4294967264 }
  0x24   :  { %333 = dma.done.wait [#allocation6], 2080  }
  0x25   :  { %334 = vsyncadd [#allocation6], 4294965216  ;;  %v342_v0 = vmov 0.0   ;;  %vm343_vm0 = vmmov 0   ;;  %v83_v1 = vld [vmem:[#allocation7 + $0x78] sm:$0xff]  ;;  %v82_v2 = vld [vmem:[#allocation7 + $0x70] sm:$0xff] }
  0x26   :  { %202 = vmatprep.subr.mxu0 %v342_v0  ;;  %234 = vmatprep.mubr.msk.f32.mxu0 %vm343_vm0, %v342_v0  ;;  %v81_v3 = vld [vmem:[#allocation7 + $0x68] sm:$0xff]  ;;  %v80_v4 = vld [vmem:[#allocation7 + $0x60] sm:$0xff]  ;;  %v57_v5 = vld [vmem:[#allocation5] sm:$0x3]  ;;  %s344_s5 = smov [#allocation8]  }
  0x27   :  { %203 = vmatpush3.msra.mxu0 %v83_v1  ;;  %v79_v6 = vld [vmem:[#allocation7 + $0x58] sm:$0xff]  ;;  %v58_v7 = vunpack.c.l.bf16 %v57_v5  ;;  %v78_v8 = vld [vmem:[#allocation7 + $0x50] sm:$0xff]  ;;  %v77_v10 = vld [vmem:[#allocation7 + $0x48] sm:$0xff]  ;;  %s173_s6 = sshll.u32 %s344_s5, 4  ;;  %s174_s6 = int_to_ptr.vmem [resolvable:$true] %s173_s6 }
  0x28   :  { %204 = vmatprep.subr.mxu0 %v342_v0  ;;  %v76_v11 = vld [vmem:[#allocation7 + $0x40] sm:$0xff]  ;;  %v75_v12 = vld [vmem:[#allocation7 + $0x38] sm:$0xff]  ;;  %v74_v13 = vld [vmem:[#allocation7 + $0x30] sm:$0xff]  ;;  %s311_s7 = scalar_lea.vmem %s174_s6, 64  ;;  %p316_p2 = scmp.lt.s32.totalorder %s174_s6, %s174_s6 }
  0x29   :  { %205 = vmatpush3.msra.mxu0 %v82_v2  ;;  %v183_v9 = vmul.f32 -1.442695, %v58_v7  ;;  %v73_v14 = vld [vmem:[#allocation7 + $0x28] sm:$0xff]  ;;  %v72_v15 = vld [vmem:[#allocation7 + $0x20] sm:$0xff]  ;;  %v71_v16 = vld [vmem:[#allocation7 + $0x18] sm:$0xff]  ;;  %p312_p1 = scmp.ne.s32.totalorder %s174_s6, %s311_s7  ;;  %p317_p3 = scmp.lt.s32.totalorder %s311_s7, %s311_s7 }
  0x2a   :  { %206 = vmatprep.subr.mxu0 %v342_v0  ;;  %v70_v18 = vld [vmem:[#allocation7 + $0x10] sm:$0xff]  ;;  %v69_v20 = vld [vmem:[#allocation7 + $0x8] sm:$0xff]  ;;  %v68_v21 = vld [vmem:[#allocation7] sm:$0xff] }
  0x2b   :  { %207 = vmatpush3.msra.mxu0 %v81_v3  ;;  %245 = vpow2.f32 %v183_v9  ;;  %v55_v22 = vld [vmem:[#allocation2] sm:$0x3]  ;;  %p318_p4 = por %p317_p3, %p316_p2 }
  0x2c   :  { %208 = vmatprep.subr.mxu0 %v342_v0  ;;  %v56_v23 = vunpack.c.l.bf16 %v55_v22  ;;  %v184_v33 = vld [vmem:[%s387_s2] ss:$0 sm:$0xff] }
  0x2d   :  { %209 = vmatpush3.msra.mxu0 %v80_v4  ;;  %p319_p5 = pnand %p318_p4, %p312_p1 }
  0x2e   :  { %210 = vmatprep.subr.mxu0 %v342_v0 }
  0x2f   :  { %211 = vmatpush3.msra.mxu0 %v79_v6 }
  0x30   :  { %212 = vmatprep.subr.mxu0 %v342_v0 }
  0x31   :  { %213 = vmatpush3.msra.mxu0 %v78_v8 }
  0x32   :  { %214 = vmatprep.subr.mxu0 %v342_v0 }
  0x33   :  { %215 = vmatpush3.msra.mxu0 %v77_v10 }
  0x34   :  { %216 = vmatprep.subr.mxu0 %v342_v0 }
  0x35   :  { %217 = vmatpush3.msra.mxu0 %v76_v11 }
  0x36   :  { %218 = vmatprep.subr.mxu0 %v342_v0 }
  0x37   :  { %219 = vmatpush3.msra.mxu0 %v75_v12 }
  0x38   :  { %220 = vmatprep.subr.mxu0 %v342_v0  ;;  %v246_v17 = vpop.eup %245 }
  0x39   :  { %221 = vmatpush3.msra.mxu0 %v74_v13  ;;  %v62_v19 = vadd.f32 1.0, %v246_v17 }
  0x3a   :  { %222 = vmatprep.subr.mxu0 %v342_v0 }
  0x3b   :  { %223 = vmatpush3.msra.mxu0 %v73_v14  ;;  %247 = vrcp.f32 %v62_v19 }
  0x3c   :  { %224 = vmatprep.subr.mxu0 %v342_v0 }
  0x3d   :  { %225 = vmatpush3.msra.mxu0 %v72_v15 }
  0x3e   :  { %226 = vmatprep.subr.mxu0 %v342_v0 }
  0x3f   :  { %227 = vmatpush3.msra.mxu0 %v71_v16 }
  0x40   :  { %228 = vmatprep.subr.mxu0 %v342_v0 }
  0x41   :  { %229 = vmatpush3.msra.mxu0 %v70_v18 }
  0x42   :  { %230 = vmatprep.subr.mxu0 %v342_v0 }
  0x43   :  { %231 = vmatpush3.msra.mxu0 %v69_v20 }
  0x44   :  { %232 = vmatprep.subr.mxu0 %v342_v0 }
  0x45   :  { %233 = vmatpush3.msra.mxu0 %v68_v21 }
  0x48   :  { %v248_v24 = vpop.eup %247 }
  0x49   :  { %v65_v25 = vmul.f32 %v248_v24, %v58_v7 }
  0x4b   :  { %v66_v26 = vmul.f32 %v65_v25, %v56_v23 }
  0x4d   :  { %v84_v27 = vmul.f32 %v66_v26, %v66_v26 }
  0x4f   :  { %235 = vmatmul.mubr.f32.vlgmr.msra.gmra.mxu0 %v84_v27 }
 0x10f   :  { %v151_v28 = vpop.f32.mrf.mxu0 }
 0x110   :  { %v155_v29 = vmul.f32 0.03125, %v151_v28 }
 0x111   :  { %v236_v30 = vpop.f32.mrf.mxu0 }
 0x112   :  { %v156_v31 = vadd.f32 1e-06, %v155_v29 }
 0x114   :  { %249 = vrsqrt.f32 %v156_v31 }
 0x121   :  { %v250_v32 = vpop.eup %249 }
 0x122   :  { %v158_v34 = vmul.f32 %v250_v32, %v66_v26 }
 0x124   :  { %v165_v35 = vmul.f32 %v184_v33, %v158_v34 }
 0x126   :  { %166 = vst [vmem:[#allocation8] sm:$0xf] %v165_v35 }
 0x127   :  { %322 = shalt.err (!%p319_p5)
}
 0x128   :  { %176 = dma.vmem_to_hbm [thread:$0]  %s174_s6, 64, %s389_s4, [#allocation4]  }
 0x129   :  { %335 = dma.done.wait [#allocation4], 64  }
 0x12a   :  { %336 = vsyncadd [#allocation4], 4294967232 }
 0x12b   :  { %180 = vsyncpa [#allocation3], 1 }
 0x12c   :  { %181 = vsyncpa [#allocation6], 1 }
 0x12d   :  { %182 = vsyncpa [#allocation4], 1 }

</bundles_post_ra>
